<compile_context>
chip_gen: v7x
topology: tpu7x:2x2x1
jax: 0.10.0
libtpu: 0.0.40
codegen_flags: <defaults>
</compile_context>

<pallas_src>
import numpy as np
import jax
import jax.numpy as jnp
from jax.experimental import pallas as pl
from jax.experimental.pallas import tpu as pltpu


# ----------------------------------------------------------------------------
# Synthetic graph (stands in for the undefined graph.NEURON_LIST / I / O)
# entry n = [layer_idx, _, _, order_idx, connections]; connection = (src_net_idx, src_channel)
# ----------------------------------------------------------------------------
I_IN = 4      # input channels  (I in the reference)
O_OUT = 2     # output channels (O in the reference)
BATCH = 8     # multiple of 8 -> full sublanes
SEQ = 8       # recurrence steps run inside one kernel launch

NEURON_LIST = [
    [0, 0, 0, 0, []],                                   # layer 0: input (grouped conv)
    [1, 0, 0, 1, [(0, 0), (0, 1), (2, 0)]],             # layer 1: input ch0, ch1, layer2 ch0 (recurrent)
    [2, 0, 0, 2, [(0, 2), (0, 3), (1, 0), (1, 1)]],     # layer 2
    [-1, 0, 0, -1, [(1, 2), (2, 0), (2, 1)]],           # output layer
]


def xli_list(net):
    # verbatim from the reference
    l = []
    for n in net:
        i = 0
        for c in n[-1]:
            if c[0] == 0:
                l += [[0, n[3], 0, n[0], c[1], i]]
            else:
                l += [[net[c[0]][3], n[3], net[c[0]][0], n[0], c[1], i]]
            i += 1
    return np.array(l)


def build_graph(net, I, O):
    # mirrors pRNN.__init__ (the numpy/glue part)
    list_step = xli_list(net)
    list_step[list_step == -1] = list_step[:, 3].max() + 1
    orderForward = np.lexsort((list_step[:, -1], list_step[:, 1]))
    forward_step = list_step[orderForward]
    prnn_located = forward_step[:, 0] > forward_step[:, 1]
    real_out = np.unique(list_step[:, [2, -2]], axis=0)
    out_layers = np.unique(real_out[:, 0], return_counts=True)
    in_layers = np.unique(list_step[:, 3], return_counts=True)
    N = len(in_layers[0]) + 1
    p = np.zeros((N, 3)).astype(int)
    p[:, 0] = np.arange(N).astype(int)
    p[(0, -1), (1, -1)] = (I, O)
    p[in_layers[0], 1] = in_layers[1]
    p[out_layers[0], 2] = out_layers[1]
    forward_step = np.concatenate((forward_step, prnn_located[:, None]), axis=1)
    group_calcul = np.split(
        forward_step, np.unique(forward_step[:, 1], return_index=True)[1][1:])
    group_calcul = [g.tolist() for g in group_calcul]
    return p, group_calcul


# ----------------------------------------------------------------------------
# Pallas kernel: one grid step = one recurrence step on the packed trace.
# ----------------------------------------------------------------------------
def make_kernel(G):
    def kernel(x_ref, aux_ref, w_ref, tr0_ref, y_ref, state_ref):
        # x_ref   : (1, B, C_pad)   input of this step, zero-padded lanes
        # aux_ref : (3+2G, C_pad)   rows: conv_w, conv_b, mask0, biases[G], masks[G]
        # w_ref   : (G, C_pad, C_pad)  folded selection+weight per group
        # tr0_ref : (B, C_pad)      initial packed trace state
        # y_ref   : (1, B, C_pad)   full packed trace emitted at every step
        # state_ref: VMEM scratch (B, C_pad) carried across grid steps
        t = pl.program_id(0)

        @pl.when(t == 0)
        def _():
            state_ref[...] = tr0_ref[...]

        trace = state_ref[...]                       # previous-step packed trace
        x = x_ref[0]                                 # (B, C_pad)

        # Layer 0: grouped 1x1 conv + ReLU == per-channel affine + ReLU
        w0 = aux_ref[0:1, :]
        b0 = aux_ref[1:2, :]
        m0 = aux_ref[2:3, :]
        layer0 = jnp.maximum(x * w0 + b0, 0.0)
        trace = m0 * layer0 + (1.0 - m0) * trace

        # Each group: lane-dense matmul over the packed trace, masked write-back.
        # (Selection of source channels is pre-folded into w_ref on the host.)
        for g in range(G):
            upd = jnp.dot(trace, w_ref[g],
                          preferred_element_type=jnp.float32) + aux_ref[3 + g:4 + g, :]
            m = aux_ref[3 + G + g:4 + G + g, :]
            trace = m * upd + (1.0 - m) * trace

        state_ref[...] = trace
        y_ref[0] = trace

    return kernel


def prnn_forward(x_seq, conv_w, conv_b, lin_w, lin_b, p, group_calcul,
                 trace_init=None):
    """Run SEQ recurrence steps of the pRNN forward pass in one kernel launch.

    x_seq: (T, B, I) float32. Returns (outputs (T, B, O), final packed state).
    """
    Tlen, B, I = x_seq.shape
    N = p.shape[0]
    widths = [int(v) for v in p[:, 2]]
    offs = np.concatenate(([0], np.cumsum(widths)))[:-1].astype(int)
    C_total = int(sum(widths))
    C_pad = max(128, ((C_total + 127) // 128) * 128)
    G = len(group_calcul)
    assert int(p[0, 1]) == int(p[0, 2]), "grouped 1x1 conv assumed channel-preserving"

    conv_w_np = np.asarray(conv_w, np.float32).reshape(-1)
    conv_b_np = np.asarray(conv_b, np.float32).reshape(-1)

    # --- host-side packing of all parameters (zero runtime cost) -------------
    aux = np.zeros((3 + 2 * G, C_pad), np.float32)
    aux[0, :I] = conv_w_np
    aux[1, :I] = conv_b_np
    aux[2, offs[0]:offs[0] + widths[0]] = 1.0
    w_big = np.zeros((G, C_pad, C_pad), np.float32)
    for g, gc in enumerate(group_calcul):
        dst = int(gc[-1][3])
        out_k = widths[dst]
        wt = np.asarray(lin_w[dst], np.float32).T           # torch.t(weight): (in_k, out_k)
        for i, step in enumerate(gc):
            src_layer, src_ch = int(step[2]), int(step[4])
            w_big[g, offs[src_layer] + src_ch, offs[dst]:offs[dst] + out_k] = wt[i, :]
        aux[3 + g, offs[dst]:offs[dst] + out_k] = np.asarray(lin_b[dst], np.float32)
        aux[3 + G + g, offs[dst]:offs[dst] + out_k] = 1.0

    x_pad = jnp.zeros((Tlen, B, C_pad), jnp.float32)
    x_pad = x_pad.at[:, :, :I].set(x_seq.astype(jnp.float32))
    if trace_init is None:
        trace_init = jnp.zeros((B, C_pad), jnp.float32)

    kernel = make_kernel(G)
    y = pl.pallas_call(
        kernel,
        out_shape=jax.ShapeDtypeStruct((Tlen, B, C_pad), jnp.float32),
        grid=(Tlen,),
        in_specs=[
            pl.BlockSpec((1, B, C_pad), lambda t: (t, 0, 0)),            # x (per-step)
            pl.BlockSpec((3 + 2 * G, C_pad), lambda t: (0, 0)),          # packed aux params
            pl.BlockSpec((G, C_pad, C_pad), lambda t: (0, 0, 0)),        # folded weights
            pl.BlockSpec((B, C_pad), lambda t: (0, 0)),                  # initial state
        ],
        out_specs=pl.BlockSpec((1, B, C_pad), lambda t: (t, 0, 0)),      # lane-dense slab
        scratch_shapes=[pltpu.VMEM((B, C_pad), jnp.float32)],            # persistent trace
        compiler_params=pltpu.CompilerParams(
            dimension_semantics=("arbitrary",)),                          # sequential recurrence
    )(x_pad, jnp.asarray(aux), jnp.asarray(w_big), trace_init)

    out_off = int(offs[N - 1])
    O = widths[N - 1]
    return y[:, :, out_off:out_off + O], y[-1]


# ----------------------------------------------------------------------------
# Pure numpy reference (mirrors pRNN.forward + PRNNFunction.forward, with the
# trace persisting across calls exactly like self.trace does in PyTorch).
# ----------------------------------------------------------------------------
def prnn_reference_seq(x_seq, conv_w, conv_b, lin_w, lin_b, p, group_calcul):
    N = p.shape[0]
    Tlen, B, _ = x_seq.shape
    trace = [np.zeros((B, int(p[k, 2])), np.float32) for k in range(N)]
    outs = []
    for t in range(Tlen):
        trace[0] = np.maximum(x_seq[t] * conv_w[None, :] + conv_b[None, :], 0.0)
        for gc in group_calcul:
            cols = [trace[int(s[2])][:, int(s[4]):int(s[4]) + 1] for s in gc]
            tensor = np.concatenate(cols, axis=1)
            dst = int(gc[-1][3])
            trace[dst] = tensor @ lin_w[dst].T + lin_b[dst][None, :]
        outs.append(trace[N - 1].copy())
    return np.stack(outs), trace


if __name__ == "__main__":
    p, group_calcul = build_graph(NEURON_LIST, I_IN, O_OUT)
    N = p.shape[0]

    key = jax.random.PRNGKey(0)
    keys = jax.random.split(key, 2 * N + 1)
    # Conv1d(p[0,1], p[0,2], 1, groups=p[0,1]): weight (out,1,1)->flattened, bias (out,)
    conv_w = jax.random.uniform(keys[0], (int(p[0, 2]),), jnp.float32, -0.5, 0.5)
    conv_b = jax.random.uniform(keys[1], (int(p[0, 2]),), jnp.float32, -0.5, 0.5)
    lin_w, lin_b = {}, {}
    for k in range(1, N):
        lin_w[k] = jax.random.uniform(keys[2 * k], (int(p[k, 2]), int(p[k, 1])),
                                      jnp.float32, -0.5, 0.5)
        lin_b[k] = jax.random.uniform(keys[2 * k + 1], (int(p[k, 2]),),
                                      jnp.float32, -0.5, 0.5)
    x_seq = jax.random.uniform(keys[-1], (SEQ, BATCH, I_IN), jnp.float32, -1.0, 1.0)

    y_seq, final_state = prnn_forward(x_seq, conv_w, conv_b, lin_w, lin_b,
                                      p, group_calcul)
    y_seq = jax.block_until_ready(y_seq)
    final_state = jax.block_until_ready(final_state)

    ref_y, ref_trace = prnn_reference_seq(
        np.asarray(x_seq), np.asarray(conv_w), np.asarray(conv_b),
        {k: np.asarray(v) for k, v in lin_w.items()},
        {k: np.asarray(v) for k, v in lin_b.items()},
        p, group_calcul)

    assert y_seq.shape == (SEQ, BATCH, O_OUT), y_seq.shape
    assert np.allclose(np.asarray(y_seq), ref_y, rtol=1e-4, atol=1e-4), \
        (np.asarray(y_seq), ref_y)
    packed_ref = np.concatenate([ref_trace[k] for k in range(N)], axis=1)
    assert np.allclose(np.asarray(final_state)[:, :packed_ref.shape[1]],
                       packed_ref, rtol=1e-4, atol=1e-4)
    print("KERNEL_OK")
</pallas_src>

<mosaic_0001>
module attributes {stable_mosaic.version = 11 : i64} {
  func.func @kernel(%arg0: i32, %arg1: memref<1x8x128xf32, #tpu.memory_space<vmem>>, %arg2: memref<9x128xf32, #tpu.memory_space<vmem>>, %arg3: memref<3x128x128xf32, #tpu.memory_space<vmem>>, %arg4: memref<8x128xf32, #tpu.memory_space<vmem>>, %arg5: memref<1x8x128xf32, #tpu.memory_space<vmem>>, %arg6: memref<8x128xf32, #tpu.memory_space<vmem>>) attributes {dimension_semantics = [#tpu.dimension_semantics<arbitrary>], iteration_bounds = array<i64: 8>, scalar_prefetch = 0 : i64, scratch_operands = 1 : i64, tpu.core_type = #tpu.core_type<tc>, window_params = [{transform_indices = @transform_0, window_bounds = array<i64: 1, 8, 128>}, {pipeline_mode = #tpu.pipeline_mode<synchronous>, transform_indices = @transform_1, window_bounds = array<i64: 9, 128>}, {pipeline_mode = #tpu.pipeline_mode<synchronous>, transform_indices = @transform_2, window_bounds = array<i64: 3, 128, 128>}, {pipeline_mode = #tpu.pipeline_mode<synchronous>, transform_indices = @transform_3, window_bounds = array<i64: 8, 128>}, {transform_indices = @transform_4, window_bounds = array<i64: 1, 8, 128>}]} {
    %c0_i32 = arith.constant 0 : i32
    %0 = arith.cmpi eq, %arg0, %c0_i32 : i32
    %1 = arith.extui %0 : i1 to i32
    %c0_i32_0 = arith.constant 0 : i32
    %2 = arith.cmpi ne, %1, %c0_i32_0 : i32
    scf.if %2 {
      %c0_36 = arith.constant 0 : index
      %c0_37 = arith.constant 0 : index
      %68 = vector.load %arg4[%c0_36, %c0_37] : memref<8x128xf32, #tpu.memory_space<vmem>>, vector<8x128xf32>
      %c0_38 = arith.constant 0 : index
      %c0_39 = arith.constant 0 : index
      %69 = vector.load %arg6[%c0_38, %c0_39] : memref<8x128xf32, #tpu.memory_space<vmem>>, vector<8x128xf32>
      tpu.vector_store %arg6[%c0_38, %c0_39], %68 {strides = array<i32>} : memref<8x128xf32, #tpu.memory_space<vmem>>, vector<8x128xf32>,
    } else {
    }
    %c0 = arith.constant 0 : index
    %c0_1 = arith.constant 0 : index
    %3 = vector.load %arg6[%c0, %c0_1] : memref<8x128xf32, #tpu.memory_space<vmem>>, vector<8x128xf32>
    %c0_2 = arith.constant 0 : index
    %c0_3 = arith.constant 0 : index
    %c0_4 = arith.constant 0 : index
    %4 = vector.load %arg1[%c0_2, %c0_3, %c0_4] : memref<1x8x128xf32, #tpu.memory_space<vmem>>, vector<1x8x128xf32>
    %5 = vector.shape_cast %4 : vector<1x8x128xf32> to vector<8x128xf32>
    %c0_5 = arith.constant 0 : index
    %c0_6 = arith.constant 0 : index
    %6 = vector.load %arg2[%c0_5, %c0_6] : memref<9x128xf32, #tpu.memory_space<vmem>>, vector<1x128xf32>
    %c1 = arith.constant 1 : index
    %c0_7 = arith.constant 0 : index
    %7 = vector.load %arg2[%c1, %c0_7] : memref<9x128xf32, #tpu.memory_space<vmem>>, vector<1x128xf32>
    %c2 = arith.constant 2 : index
    %c0_8 = arith.constant 0 : index
    %8 = vector.load %arg2[%c2, %c0_8] : memref<9x128xf32, #tpu.memory_space<vmem>>, vector<1x128xf32>
    %9 = vector.broadcast %6 : vector<1x128xf32> to vector<8x128xf32>
    %10 = arith.mulf %5, %9 : vector<8x128xf32>
    %11 = vector.broadcast %7 : vector<1x128xf32> to vector<8x128xf32>
    %12 = arith.addf %10, %11 : vector<8x128xf32>
    %cst = arith.constant 0.000000e+00 : f32
    %13 = vector.broadcast %cst : f32 to vector<8x128xf32>
    %14 = arith.maximumf %12, %13 : vector<8x128xf32>
    %15 = vector.broadcast %8 : vector<1x128xf32> to vector<8x128xf32>
    %16 = arith.mulf %15, %14 : vector<8x128xf32>
    %cst_9 = arith.constant 1.000000e+00 : f32
    %17 = vector.broadcast %cst_9 : f32 to vector<1x128xf32>
    %18 = arith.subf %17, %8 : vector<1x128xf32>
    %19 = vector.broadcast %18 : vector<1x128xf32> to vector<8x128xf32>
    %20 = arith.mulf %19, %3 : vector<8x128xf32>
    %21 = arith.addf %16, %20 : vector<8x128xf32>
    %c0_10 = arith.constant 0 : index
    %c0_11 = arith.constant 0 : index
    %c0_12 = arith.constant 0 : index
    %22 = vector.load %arg3[%c0_10, %c0_11, %c0_12] : memref<3x128x128xf32, #tpu.memory_space<vmem>>, vector<1x128x128xf32>
    %23 = vector.shape_cast %22 : vector<1x128x128xf32> to vector<128x128xf32>
    %cst_13 = arith.constant dense<0.000000e+00> : vector<8x128xf32>
    %24 = tpu.matmul %21, %23, %cst_13 {dimension_numbers = #tpu.dot_dimension_numbers<[1], [0], [0], [1], [0, 0, 1, 1], [], []>} : vector<8x128xf32>, vector<128x128xf32>, vector<8x128xf32> -> vector<8x128xf32>
    %c3 = arith.constant 3 : index
    %c0_14 = arith.constant 0 : index
    %25 = vector.load %arg2[%c3, %c0_14] : memref<9x128xf32, #tpu.memory_space<vmem>>, vector<1x128xf32>
    %26 = vector.broadcast %25 : vector<1x128xf32> to vector<8x128xf32>
    %27 = arith.addf %24, %26 : vector<8x128xf32>
    %c6 = arith.constant 6 : index
    %c0_15 = arith.constant 0 : index
    %28 = vector.load %arg2[%c6, %c0_15] : memref<9x128xf32, #tpu.memory_space<vmem>>, vector<1x128xf32>
    %29 = vector.broadcast %28 : vector<1x128xf32> to vector<8x128xf32>
    %30 = arith.mulf %29, %27 : vector<8x128xf32>
    %cst_16 = arith.constant 1.000000e+00 : f32
    %31 = vector.broadcast %cst_16 : f32 to vector<1x128xf32>
    %32 = arith.subf %31, %28 : vector<1x128xf32>
    %33 = vector.broadcast %32 : vector<1x128xf32> to vector<8x128xf32>
    %34 = arith.mulf %33, %21 : vector<8x128xf32>
    %35 = arith.addf %30, %34 : vector<8x128xf32>
    %c1_17 = arith.constant 1 : index
    %c0_18 = arith.constant 0 : index
    %c0_19 = arith.constant 0 : index
    %36 = vector.load %arg3[%c1_17, %c0_18, %c0_19] : memref<3x128x128xf32, #tpu.memory_space<vmem>>, vector<1x128x128xf32>
    %37 = vector.shape_cast %36 : vector<1x128x128xf32> to vector<128x128xf32>
    %cst_20 = arith.constant dense<0.000000e+00> : vector<8x128xf32>
    %38 = tpu.matmul %35, %37, %cst_20 {dimension_numbers = #tpu.dot_dimension_numbers<[1], [0], [0], [1], [0, 0, 1, 1], [], []>} : vector<8x128xf32>, vector<128x128xf32>, vector<8x128xf32> -> vector<8x128xf32>
    %c4 = arith.constant 4 : index
    %c0_21 = arith.constant 0 : index
    %39 = vector.load %arg2[%c4, %c0_21] : memref<9x128xf32, #tpu.memory_space<vmem>>, vector<1x128xf32>
    %40 = vector.broadcast %39 : vector<1x128xf32> to vector<8x128xf32>
    %41 = arith.addf %38, %40 : vector<8x128xf32>
    %c7 = arith.constant 7 : index
    %c0_22 = arith.constant 0 : index
    %42 = vector.load %arg2[%c7, %c0_22] : memref<9x128xf32, #tpu.memory_space<vmem>>, vector<1x128xf32>
    %43 = vector.broadcast %42 : vector<1x128xf32> to vector<8x128xf32>
    %44 = arith.mulf %43, %41 : vector<8x128xf32>
    %cst_23 = arith.constant 1.000000e+00 : f32
    %45 = vector.broadcast %cst_23 : f32 to vector<1x128xf32>
    %46 = arith.subf %45, %42 : vector<1x128xf32>
    %47 = vector.broadcast %46 : vector<1x128xf32> to vector<8x128xf32>
    %48 = arith.mulf %47, %35 : vector<8x128xf32>
    %49 = arith.addf %44, %48 : vector<8x128xf32>
    %c2_24 = arith.constant 2 : index
    %c0_25 = arith.constant 0 : index
    %c0_26 = arith.constant 0 : index
    %50 = vector.load %arg3[%c2_24, %c0_25, %c0_26] : memref<3x128x128xf32, #tpu.memory_space<vmem>>, vector<1x128x128xf32>
    %51 = vector.shape_cast %50 : vector<1x128x128xf32> to vector<128x128xf32>
    %cst_27 = arith.constant dense<0.000000e+00> : vector<8x128xf32>
    %52 = tpu.matmul %49, %51, %cst_27 {dimension_numbers = #tpu.dot_dimension_numbers<[1], [0], [0], [1], [0, 0, 1, 1], [], []>} : vector<8x128xf32>, vector<128x128xf32>, vector<8x128xf32> -> vector<8x128xf32>
    %c5 = arith.constant 5 : index
    %c0_28 = arith.constant 0 : index
    %53 = vector.load %arg2[%c5, %c0_28] : memref<9x128xf32, #tpu.memory_space<vmem>>, vector<1x128xf32>
    %54 = vector.broadcast %53 : vector<1x128xf32> to vector<8x128xf32>
    %55 = arith.addf %52, %54 : vector<8x128xf32>
    %c8 = arith.constant 8 : index
    %c0_29 = arith.constant 0 : index
    %56 = vector.load %arg2[%c8, %c0_29] : memref<9x128xf32, #tpu.memory_space<vmem>>, vector<1x128xf32>
    %57 = vector.broadcast %56 : vector<1x128xf32> to vector<8x128xf32>
    %58 = arith.mulf %57, %55 : vector<8x128xf32>
    %cst_30 = arith.constant 1.000000e+00 : f32
    %59 = vector.broadcast %cst_30 : f32 to vector<1x128xf32>
    %60 = arith.subf %59, %56 : vector<1x128xf32>
    %61 = vector.broadcast %60 : vector<1x128xf32> to vector<8x128xf32>
    %62 = arith.mulf %61, %49 : vector<8x128xf32>
    %63 = arith.addf %58, %62 : vector<8x128xf32>
    %c0_31 = arith.constant 0 : index
    %c0_32 = arith.constant 0 : index
    %64 = vector.load %arg6[%c0_31, %c0_32] : memref<8x128xf32, #tpu.memory_space<vmem>>, vector<8x128xf32>
    tpu.vector_store %arg6[%c0_31, %c0_32], %63 {strides = array<i32>} : memref<8x128xf32, #tpu.memory_space<vmem>>, vector<8x128xf32>,
    %c0_33 = arith.constant 0 : index
    %c0_34 = arith.constant 0 : index
    %c0_35 = arith.constant 0 : index
    %65 = vector.load %arg5[%c0_33, %c0_34, %c0_35] : memref<1x8x128xf32, #tpu.memory_space<vmem>>, vector<1x8x128xf32>
    %66 = vector.shape_cast %65 : vector<1x8x128xf32> to vector<8x128xf32>
    %67 = vector.shape_cast %63 : vector<8x128xf32> to vector<1x8x128xf32>
    tpu.vector_store %arg5[%c0_33, %c0_34, %c0_35], %67 {strides = array<i32>} : memref<1x8x128xf32, #tpu.memory_space<vmem>>, vector<1x8x128xf32>,
    return
  }
  func.func @transform_0(%arg0: i32) -> (i32, i32, i32) {
    %c0_i32 = arith.constant 0 : i32
    %c0_i32_0 = arith.constant 0 : i32
    %c0_i32_1 = arith.constant 0 : i32
    return %arg0, %c0_i32, %c0_i32_0 : i32, i32, i32
  }
  func.func @transform_1(%arg0: i32) -> (i32, i32) {
    %c0_i32 = arith.constant 0 : i32
    %c0_i32_0 = arith.constant 0 : i32
    %c0_i32_1 = arith.constant 0 : i32
    return %c0_i32, %c0_i32_0 : i32, i32
  }
  func.func @transform_2(%arg0: i32) -> (i32, i32, i32) {
    %c0_i32 = arith.constant 0 : i32
    %c0_i32_0 = arith.constant 0 : i32
    %c0_i32_1 = arith.constant 0 : i32
    %c0_i32_2 = arith.constant 0 : i32
    return %c0_i32, %c0_i32_0, %c0_i32_1 : i32, i32, i32
  }
  func.func @transform_3(%arg0: i32) -> (i32, i32) {
    %c0_i32 = arith.constant 0 : i32
    %c0_i32_0 = arith.constant 0 : i32
    %c0_i32_1 = arith.constant 0 : i32
    return %c0_i32, %c0_i32_0 : i32, i32
  }
  func.func @transform_4(%arg0: i32) -> (i32, i32, i32) {
    %c0_i32 = arith.constant 0 : i32
    %c0_i32_0 = arith.constant 0 : i32
    %c0_i32_1 = arith.constant 0 : i32
    return %arg0, %c0_i32, %c0_i32_0 : i32, i32, i32
  }
}

</mosaic_0001>

<bundles_post_ra>
// kernel: tpu_custom_call.1
= control target key start
LH: loop header
LB: loop body
LE: loop exit
PB: predicated region body
PF: predicated region fallthrough
CT: control target
= control target key end

     0   :  { %9 = vsyncpa [#allocation4], 0  ;;  %s1482_s0 = inlined_call_operand.hbm [shape: f32[8,8,128], index: 0, kind: input, shape index: {}]   ;;  %s1483_s1 = inlined_call_operand.hbm [shape: f32[9,128], index: 1, kind: input, shape index: {}]   ;;  %s1484_s2 = inlined_call_operand.hbm [shape: f32[3,128,128], index: 2, kind: input, shape index: {}]   ;;  %s1485_s3 = inlined_call_operand.vmem [shape: f32[8,128], index: 3, kind: input, shape index: {}]   ;;  %s1486_s4 = inlined_call_operand.hbm [shape: f32[8,8,128], index: 4, kind: output, shape index: {}]  }
   0x1   :  { %11 = vsyncpa [#allocation4 + $0x1], 0 }
   0x2   :  { %12 = vsyncpa [#allocation7], 0 }
   0x3   :  { %13 = vsyncpa [#allocation5], 0 }
   0x4   :  { %15 = vsyncpa [#allocation5 + $0x1], 0  ;;  %s1209_s15 = smov 0   ;;  %s1211_s16 = smov 0  }
   0x5   :  { %s1213_s17 = smov 0   ;;  %s1215_s18 = smov 0  }
   0x6 LB: > { %s1230_s19 = sadd.s32 4294967295, %s1173_s18   ;;  %s695_s20 = sadd.s32 4294967294, %s1173_s18   ;;  %s1173_s18 = sphi %s1215_s18, %s1506_s18   ;;  %s1169_s17 = sphi %s1213_s17, %s1505_s17   ;;  %s1165_s16 = sphi %s1211_s16, %s1504_s16   ;;  %s1161_s15 = sphi %s1209_s15, %s1503_s15  }
   0x7   : > { %p41_p0 = scmp.ne.s32.totalorder %s1165_s16, %s1161_s15  ;;  %p1487_p1 = scmp.eq.s32.totalorder %s1230_s19, 0 }
   0x8   : > { %p134_p3 = scmp.eq.s32.totalorder %s695_s20, 7  ;;  %p696_p5 = scmp.ge.s32.totalorder %s1173_s18, 1 }
   0x9   : > { %p1239_p4 = por %p1487_p1, %p41_p0  ;;  %p141_p7 = scmp.lt.s32.totalorder %s1173_s18, 9 }
   0xa   : > { %p1244_p6 = por %p134_p3, %p41_p0  ;;  %s1175_s24 = smov [#allocation6]  }
   0xb   : > { %s1490_s21 = scalar_select %p1239_p4, 1, 0 }
   0xc   : > { %s1491_s22 = scalar_select %p1244_p6, 1, 0 }
   0xd   : > { %p1250_p9 = pnand %p696_p5, %p141_p7  ;;  %s153_s25 = sshll.u32 %s1175_s24, 4  ;;  %s154_s25 = int_to_ptr.vmem [resolvable:$true] %s153_s25 }
   0xe   : > { %s1176_s27 = smov [#allocation8]   ;;  %s1017_s5 = scalar_lea.hbm %s1483_s1, 256 }
   0xf   : > { %s1492_s23 = scalar_select %p1250_p9, 1, 0 }
  0x10   : > { %p957_p10 = pneg %p1250_p9  ;;  %s166_s28 = sshll.u32 %s1176_s27, 4  ;;  %s1262_s28 = int_to_ptr.vmem [resolvable:$true] %s166_s28 }
  0x11   : > { %p1018_p12 = scmp.ne.s32.totalorder %s1483_s1, %s1017_s5  ;;  %p1024_p5 = scmp.lt.u32.totalorder %s1017_s5, %s1483_s1 }
  0x12   : > { %p1258_p11 = pnand %p957_p10, %p1487_p1 }
  0x14   : > { %p1019_p13 = pneg %p1258_p11 }
  0x16   : > { %p1020_p0 = pnand %p1019_p13, %p1018_p12 }
  0x18   : > { %p1021_p3 = pneg %p1020_p0 }
  0x1a   : > { %p1026_p7 = pnand %p1024_p5, %p1021_p3 }
  0x1c   : > { %1029 = shalt.err (!%p1026_p7)
}
  0x1d   : > { %s1030_s10 = scalar_lea.vmem %s154_s25, 256  ;;  %p1038_p2 = scmp.lt.s32.totalorder %s154_s25, %s154_s25 }
  0x1e   : > { %p1031_p10 = scmp.ne.s32.totalorder %s154_s25, %s1030_s10  ;;  %p1039_p6 = scmp.lt.s32.totalorder %s1030_s10, %s1030_s10 }
  0x20   : > { %p1033_p8 = pnand %p1031_p10, %p1019_p13  ;;  %p1040_p4 = por %p1039_p6, %p1038_p2 }
  0x22   : > { %p1034_p1 = pneg %p1033_p8 }
  0x24   : > { %p1041_p9 = pnand %p1040_p4, %p1034_p1 }
  0x26   : > { %1044 = shalt.err (!%p1041_p9)
}
  0x27   : > { %s1177_s11 = smov 128   ;;  %s1178_s12 = smov 8  }
  0x28   : > { %960 = dma.hbm_to_vmem [thread:$0]  (!%p1258_p11), %s1483_s1, 256, %s154_s25, [#allocation7], %s1177_s11, %s1177_s11, %s1178_s12  }
  0x29   : > { %s1045_s27 = scalar_lea.hbm %s1484_s2, 6144 }
  0x2a   : > { %p1046_p8 = scmp.ne.s32.totalorder %s1484_s2, %s1045_s27  ;;  %p1052_p4 = scmp.lt.u32.totalorder %s1045_s27, %s1484_s2 }
  0x2c   : > { %p1048_p1 = pnand %p1046_p8, %p1019_p13 }
  0x2e   : > { %p1049_p2 = pneg %p1048_p1 }
  0x30   : > { %p1054_p6 = pnand %p1052_p4, %p1049_p2 }
  0x32   : > { %1057 = shalt.err (!%p1054_p6)
}
  0x33   : > { %s1058_s25 = scalar_lea.vmem %s1262_s28, 6144  ;;  %p1066_p3 = scmp.lt.s32.totalorder %s1262_s28, %s1262_s28 }
  0x34   : > { %p1059_p9 = scmp.ne.s32.totalorder %s1262_s28, %s1058_s25  ;;  %p1067_p5 = scmp.lt.s32.totalorder %s1058_s25, %s1058_s25 }
  0x36   : > { %p1061_p12 = pnand %p1059_p9, %p1019_p13  ;;  %p1068_p7 = por %p1067_p5, %p1066_p3 }
  0x38   : > { %p1062_p0 = pneg %p1061_p12 }
  0x3a   : > { %p1069_p10 = pnand %p1068_p7, %p1062_p0 }
  0x3c   : > { %1072 = shalt.err (!%p1069_p10)
}
  0x3d   : > { %963 = dma.hbm_to_vmem [thread:$0]  (!%p1258_p11), %s1484_s2, 6144, %s1262_s28, [#allocation7], %s1177_s11, %s1177_s11, %s1178_s12  }
  0x3e   : > { %s1312_s9 = sadd.s32 1, %s1173_s18   ;;  %s28_s26 = sadd.s32 1, %s1169_s17 }
  0x3f   : > { %s25_s10 = ssub.s32 %s1173_s18, %s1312_s9  ;;  %p35_p13 = scmp.ne.s32.totalorder %s1169_s17, %s1165_s16 }
  0x40   : > { %p26_p8 = scmp.eq.s32.totalorder %s25_s10, 0  ;;  %p36_p1 = scmp.eq.s32.totalorder %s1173_s18, 0 }
  0x41   : > { %p1494_p2 = scmp.eq.s32.totalorder %s1230_s19, 7  ;;  %p974_p6 = scmp.lt.s32.totalorder %s1173_s18, 8 }
  0x42   : > { %s1328_s14 = scalar_select %p26_p8, %s1169_s17, %s28_s26  }
  0x43   : > { %p1322_p4 = por %p1494_p2, %p35_p13  ;;  %p37_p9 = por %p36_p1, %p35_p13 }
  0x44   : > { %s183_s20 = sand.u32 1, %s1169_s17   ;;  %s701_s28 = sshll.u32 %s1173_s18, 7 }
  0x45   : > { %s700_s24 = sshll.u32 %s183_s20, 3  ;;  %s1335_s27 = scalar_lea.hbm %s1482_s0, %s701_s28 }
  0x46   : > { %s187_s29 = scalar_lea.vmem [#allocation3], %s700_s24  ;;  %p1339_p11 = pnand %p974_p6, %p37_p9 }
  0x47   : > { %s194_s30 = sshll.u32 %s187_s29, 4  ;;  %s184_s6 = scalar_lea.sflag [#allocation4], %s183_s20  ;;  %s1337_s30 = int_to_ptr.vmem [resolvable:$true] %s194_s30 }
  0x48   : > { %s1073_s25 = scalar_lea.hbm %s1335_s27, 128  ;;  %p1075_p0 = pneg %p1339_p11 }
  0x49   : > { %p1074_p12 = scmp.ne.s32.totalorder %s1335_s27, %s1073_s25  ;;  %s1078_s26 = scalar_lea.hbm %s1482_s0, 1024 }
  0x4a   : > { %p1079_p7 = scmp.lt.u32.totalorder %s1335_s27, %s1482_s0  ;;  %p1080_p10 = scmp.lt.u32.totalorder %s1078_s26, %s1073_s25 }
  0x4b   : > { %p1076_p3 = pnand %p1075_p0, %p1074_p12  ;;  %p1082_p8 = scmp.lt.u32.totalorder %s1073_s25, %s1335_s27 }
  0x4c   : > { %p1081_p13 = por %p1080_p10, %p1079_p7 }
  0x4d   : > { %p1077_p5 = pneg %p1076_p3 }
  0x4e   : > { %p1083_p1 = por %p1082_p8, %p1081_p13 }
  0x50   : > { %p1084_p2 = pnand %p1083_p1, %p1077_p5 }
  0x52   : > { %1087 = shalt.err (!%p1084_p2)
}
  0x53   : > { %s1088_s20 = scalar_lea.vmem %s1337_s30, 128  ;;  %s1179_s28 = smov [#allocation3]  }
  0x54   : > { %p1089_p6 = scmp.ne.s32.totalorder %s1337_s30, %s1088_s20  ;;  %s1093_s11 = sshll.u32 %s1179_s28, 4  ;;  %s1094_s11 = int_to_ptr.vmem [resolvable:$false] %s1093_s11 }
  0x55   : > { %s1095_s12 = scalar_lea.vmem %s1094_s11, 256  ;;  %p1096_p3 = scmp.lt.s32.totalorder %s1337_s30, %s1094_s11 }
  0x56   : > { %p1091_p9 = pnand %p1089_p6, %p1075_p0  ;;  %p1097_p7 = scmp.lt.s32.totalorder %s1095_s12, %s1088_s20 }
  0x58   : > { %p1092_p12 = pneg %p1091_p9  ;;  %p1098_p10 = por %p1097_p7, %p1096_p3 }
  0x5a   : > { %p1099_p13 = pnand %p1098_p10, %p1092_p12 }
  0x5c   : > { %1102 = shalt.err (!%p1099_p13)
}
  0x5d   : > { %967 = dma.hbm_to_vmem [thread:$0]  (!%p1339_p11), %s1335_s27, 128, %s1337_s30, %s184_s6  }
  0x5e   : > { %p1497_p5 = scmp.ne.s32.totalorder %s1492_s23, 0 }
  0x5f   : > { %s1371_s29 = sand.u32 (!%p1497_p5), 1, %s1165_s16   ;;  %p1498_p0 = scmp.ne.s32.totalorder (!%p1497_p5), %s1490_s21, 0 }
  0x60   : > { %203 = sbr.rel (%p1497_p5) target bundleno = 818 (0x332), region = 36  ;;  %s703_s25 = sshll.u32 (!%p1497_p5), %s1371_s29, 3 }
  0x61   : > { %s206_s7 = scalar_lea.sflag (!%p1497_p5), [#allocation4], %s1371_s29  ;;  %s1375_s8 = scalar_lea.vmem (!%p1497_p5), [#allocation3], %s703_s25 }
  0x67   : > { %1148 = dma.done.wait (%p1498_p0), %s206_s7, 128  }
  0x68   : > { %1150 = vsyncadd (%p1498_p0), %s206_s7, 4294967168  ;;  %p1499_p11 = scmp.eq.s32.totalorder %s1230_s19, 0 }
  0x6a   : > { %1152 = dma.done.wait (%p1499_p11), [#allocation7], 6400   ;;  %p1500_p8 = pmov %p1499_p11 }
  0x6b   : > { %s1385_s23 = scalar_lea.vmem [#allocation9], %s703_s25  ;;  %p1501_p1 = scmp.ne.s32.totalorder %s1230_s19, 0 }
  0x6c   : > { %1154 = vsyncadd (%p1500_p8), [#allocation7], 4294960896  ;;  %v246_v0 = vld [vmem:[%s1485_s3] sm:$0xff] (!%p1501_p1) }
  0x6d   : > { %245 = sbr.rel (%p1501_p1) target bundleno = 116 (0x74), region = 52  ;;  %247 = vst [vmem:[#allocation2] sm:$0xff] (!%p1501_p1), %v246_v0 }
  0x74 PF: > { %v276_v1 = vld [vmem:[#allocation8] sm:$0xff]  ;;  %v277_v2 = vld [vmem:[#allocation8 + $0x8] sm:$0xff]  ;;  %v278_v3 = vld [vmem:[#allocation8 + $0x10] sm:$0xff]  ;;  %v1180_v4 = vmov 0.0|0.0   ;;  %vm1181_vm0 = vmmov 0   ;;  %v1182_v7 = vmov 0.0   ;;  %v264_v20 = vlaneseq }
  0x75   : > { %873 = vmatprep.subr.bf16.mxu0 %v1180_v4  ;;  %v874_v5 = vpack.c.bf16 %v277_v2, %v276_v1  ;;  %v279_v6 = vld [vmem:[#allocation8 + $0x18] sm:$0xff]  ;;  %800 = vmatprep.mubr.msk.f32.mxu0 %vm1181_vm0, %v1182_v7  ;;  %v280_v9 = vld [vmem:[#allocation8 + $0x20] sm:$0xff]  ;;  %v281_v10 = vld [vmem:[#allocation8 + $0x28] sm:$0xff]  ;;  %s714_s21 = sshll.u32 %s1230_s19, 7  ;;  %s606_s5 = sshll.u32 %s1385_s23, 4  ;;  %s1440_s5 = int_to_ptr.vmem [resolvable:$true] %s606_s5 }
  0x76   : > { %897 = vmatprep.subr.bf16.mxu1 %v1180_v4  ;;  %835 = vmatprep.mubr.msk.f32.mxu1 %vm1181_vm0, %v1182_v7  ;;  %v877_v8 = vpack.c.bf16 %v279_v6, %v278_v3  ;;  %v880_v11 = vpack.c.bf16 %v281_v10, %v280_v9  ;;  %v381_v12 = vld [vmem:[#allocation8 + $0x80] sm:$0xff]  ;;  %v382_v13 = vld [vmem:[#allocation8 + $0x88] sm:$0xff]  ;;  %v383_v14 = vld [vmem:[#allocation8 + $0x90] sm:$0xff]  ;;  %v265_v30 = vshrl.u32 %v264_v20, 7  ;;  %s1438_s10 = scalar_lea.hbm %s1486_s4, %s714_s21  ;;  %s593_s24 = scalar_lea.sflag [#allocation5], %s1371_s29 }
  0x77   : > { %875 = vmatpush3.bf16.msra.mxu0 %v874_v5  ;;  %v282_v15 = vld [vmem:[#allocation8 + $0x30] sm:$0xff]  ;;  %v283_v16 = vld [vmem:[#allocation8 + $0x38] sm:$0xff]  ;;  %v898_v17 = vpack.c.bf16 %v382_v13, %v381_v12  ;;  %v249_v19 = vld [vmem:[%s1375_s8] sm:$0xff]  ;;  %s1103_s20 = scalar_lea.vmem %s1440_s5, 128  ;;  %s1183_s19 = smov [#allocation9]  }
  0x78   : > { %876 = vmatprep.subr.bf16.mxu0 %v1180_v4  ;;  %v384_v18 = vld [vmem:[#allocation8 + $0x98] sm:$0xff]  ;;  %v883_v22 = vpack.c.bf16 %v283_v16, %v282_v15  ;;  %v708_v23 = vld [vmem:[#allocation6] ss:$0 sm:$0xff]  ;;  %v385_v24 = vld [vmem:[#allocation8 + $0xa0] sm:$0xff]  ;;  %v1405_v39 = vsub.s32 0, %v265_v30  ;;  %p1104_p2 = scmp.ne.s32.totalorder %s1440_s5, %s1103_s20  ;;  %s1107_s28 = sshll.u32 %s1183_s19, 4  ;;  %s1108_s28 = int_to_ptr.vmem [resolvable:$false] %s1107_s28 }
  0x79   : > { %899 = vmatpush3.bf16.msra.mxu1 %v898_v17  ;;  %v901_v21 = vpack.c.bf16 %v384_v18, %v383_v14  ;;  %v386_v25 = vld [vmem:[#allocation8 + $0xa8] sm:$0xff]  ;;  %v284_v26 = vld [vmem:[#allocation8 + $0x40] sm:$0xff]  ;;  %v709_v28 = vld [vmem:[#allocation6 + $0x1] ss:$0 sm:$0xff]  ;;  %v257_v29 = vmul.f32 %v708_v23, %v249_v19  ;;  %s1109_s11 = scalar_lea.vmem %s1108_s28, 256  ;;  %p1110_p12 = scmp.lt.s32.totalorder %s1440_s5, %s1108_s28 }
  0x7a   : > { %900 = vmatprep.subr.bf16.mxu1 %v1180_v4  ;;  %v285_v27 = vld [vmem:[#allocation8 + $0x48] sm:$0xff]  ;;  %v904_v31 = vpack.c.bf16 %v386_v25, %v385_v24  ;;  %v252_v33 = vld [vmem:[#allocation6 + $0x2] sm:$0x1]  ;;  %v388_v35 = vld [vmem:[#allocation8 + $0xb8] sm:$0xff]  ;;  %p1105_p6 = pnand %p1104_p2, %p1322_p4  ;;  %p1111_p3 = scmp.lt.s32.totalorder %s1109_s11, %s1103_s20 }
  0x7b   : > { %878 = vmatpush3.bf16.msra.mxu0 %v877_v8  ;;  %v886_v32 = vpack.c.bf16 %v285_v27, %v284_v26  ;;  %v387_v34 = vld [vmem:[#allocation8 + $0xb0] sm:$0xff]  ;;  %v287_v37 = vld [vmem:[#allocation8 + $0x58] sm:$0xff]  ;;  %v262_v38 = vadd.f32 %v709_v28, %v257_v29  ;;  %v269_v40 = vsub.f32 1.0, %v252_v33  ;;  %v389_v43 = vld [vmem:[#allocation8 + $0xc0] sm:$0xff]  ;;  %v267_v48 = vrot.slane %v252_v33, %v1405_v39 }
  0x7c   : > { %879 = vmatprep.subr.bf16.mxu0 %v1180_v4  ;;  %v286_v36 = vld [vmem:[#allocation8 + $0x50] sm:$0xff]  ;;  %v907_v41 = vpack.c.bf16 %v388_v35, %v387_v34  ;;  %v390_v44 = vld [vmem:[#allocation8 + $0xc8] sm:$0xff]  ;;  %v288_v45 = vld [vmem:[#allocation8 + $0x60] sm:$0xff]  ;;  %p1106_p9 = pneg %p1105_p6  ;;  %p1112_p7 = por %p1111_p3, %p1110_p12 }
  0x7d   : > { %902 = vmatpush3.bf16.msra.mxu1 %v901_v21  ;;  %v889_v42 = vpack.c.bf16 %v287_v37, %v286_v36  ;;  %v289_v46 = vld [vmem:[#allocation8 + $0x68] sm:$0xff]  ;;  %v263_v47 = vmax.f32 %v262_v38, 0.0  ;;  %v273_v49 = vrot.slane %v269_v40, %v1405_v39  ;;  %v910_v50 = vpack.c.bf16 %v390_v44, %v389_v43  ;;  %v248_v52 = vld [vmem:[#allocation2] sm:$0xff]  ;;  %v391_v53 = vld [vmem:[#allocation8 + $0xd0] sm:$0xff] }
  0x7e   : > { %903 = vmatprep.subr.bf16.mxu1 %v1180_v4  ;;  %v892_v51 = vpack.c.bf16 %v289_v46, %v288_v45  ;;  %v392_v54 = vld [vmem:[#allocation8 + $0xd8] sm:$0xff]  ;;  %v290_v55 = vld [vmem:[#allocation8 + $0x70] sm:$0xff]  ;;  %v393_v62 = vld [vmem:[#allocation8 + $0xe0] sm:$0xff]  ;;  %p1113_p10 = pnand %p1112_p7, %p1106_p9 }
  0x7f   : > { %881 = vmatpush3.bf16.msra.mxu0 %v880_v11  ;;  %v291_v56 = vld [vmem:[#allocation8 + $0x78] sm:$0xff]  ;;  %v268_v57 = vmul.f32 %v267_v48, %v263_v47  ;;  %v274_v58 = vmul.f32 %v273_v49, %v248_v52  ;;  %v913_v59 = vpack.c.bf16 %v392_v54, %v391_v53  ;;  %v394_v63 = vld [vmem:[#allocation8 + $0xe8] sm:$0xff]  ;;  %v395_v1 = vld [vmem:[#allocation8 + $0xf0] sm:$0xff] }
  0x80   : > { %882 = vmatprep.subr.bf16.mxu0 %v1180_v4  ;;  %v895_v60 = vpack.c.bf16 %v291_v56, %v290_v55  ;;  %v916_v0 = vpack.c.bf16 %v394_v63, %v393_v62  ;;  %v396_v2 = vld [vmem:[#allocation8 + $0xf8] sm:$0xff]  ;;  %v486_v5 = vld [vmem:[#allocation8 + $0x100] sm:$0xff]  ;;  %v487_v6 = vld [vmem:[#allocation8 + $0x108] sm:$0xff] }
  0x81   : > { %905 = vmatpush3.bf16.msra.mxu1 %v904_v31  ;;  %v275_v61 = vadd.f32 %v274_v58, %v268_v57  ;;  %v919_v3 = vpack.c.bf16 %v396_v2, %v395_v1  ;;  %v488_v8 = vld [vmem:[#allocation8 + $0x110] sm:$0xff]  ;;  %v922_v9 = vpack.c.bf16 %v487_v6, %v486_v5  ;;  %v489_v10 = vld [vmem:[#allocation8 + $0x118] sm:$0xff]  ;;  %v491_v12 = vld [vmem:[#allocation8 + $0x128] sm:$0xff] }
  0x82   : > { %906 = vmatprep.subr.bf16.mxu1 %v1180_v4  ;;  %v925_v11 = vpack.c.bf16 %v489_v10, %v488_v8  ;;  %v492_v14 = vld [vmem:[#allocation8 + $0x130] sm:$0xff]  ;;  %v493_v15 = vld [vmem:[#allocation8 + $0x138] sm:$0xff]  ;;  %v494_v17 = vld [vmem:[#allocation8 + $0x140] sm:$0xff] }
  0x83   : > { %884 = vmatpush3.bf16.msra.mxu0 %v883_v22  ;;  %v931_v16 = vpack.c.bf16 %v493_v15, %v492_v14  ;;  %v495_v18 = vld [vmem:[#allocation8 + $0x148] sm:$0xff]  ;;  %v496_v20 = vld [vmem:[#allocation8 + $0x150] sm:$0xff]  ;;  %v497_v21 = vld [vmem:[#allocation8 + $0x158] sm:$0xff] }
  0x84   : > { %885 = vmatprep.subr.bf16.mxu0 %v1180_v4  ;;  %v934_v19 = vpack.c.bf16 %v495_v18, %v494_v17  ;;  %v937_v22 = vpack.c.bf16 %v497_v21, %v496_v20  ;;  %v367_v23 = vld [vmem:[#allocation6 + $0x6] sm:$0x1]  ;;  %v710_v26 = vld [vmem:[#allocation6 + $0x3] ss:$0 sm:$0xff]  ;;  %v498_v34 = vld [vmem:[#allocation8 + $0x160] sm:$0xff] }
  0x85   : > { %908 = vmatpush3.bf16.msra.mxu1 %v907_v41  ;;  %v373_v24 = vsub.f32 1.0, %v367_v23  ;;  %v371_v27 = vrot.slane %v367_v23, %v1405_v39  ;;  %v499_v35 = vld [vmem:[#allocation8 + $0x168] sm:$0xff]  ;;  %v500_v37 = vld [vmem:[#allocation8 + $0x170] sm:$0xff]  ;;  %v501_v38 = vld [vmem:[#allocation8 + $0x178] sm:$0xff] }
  0x86   : > { %909 = vmatprep.subr.bf16.mxu1 %v1180_v4  ;;  %v940_v36 = vpack.c.bf16 %v499_v35, %v498_v34  ;;  %v943_v40 = vpack.c.bf16 %v501_v38, %v500_v37  ;;  %v472_v41 = vld [vmem:[#allocation6 + $0x7] sm:$0x1]  ;;  %v711_v43 = vld [vmem:[#allocation6 + $0x4] ss:$0 sm:$0xff]  ;;  %v712_v53 = vld [vmem:[#allocation6 + $0x5] ss:$0 sm:$0xff] }
  0x87   : > { %887 = vmatpush3.bf16.msra.mxu0 %v886_v32  ;;  %v377_v25 = vrot.slane %v373_v24, %v1405_v39  ;;  %v476_v44 = vrot.slane %v472_v41, %v1405_v39 }
  0x88   : > { %888 = vmatprep.subr.bf16.mxu0 %v1180_v4 }
  0x89   : > { %911 = vmatpush3.bf16.msra.mxu1 %v910_v50  ;;  %v378_v31 = vmul.f32 %v377_v25, %v275_v61 }
  0x8a   : > { %912 = vmatprep.subr.bf16.mxu1 %v1180_v4 }
  0x8b   : > { %890 = vmatpush3.bf16.msra.mxu0 %v889_v42  ;;  %v478_v42 = vsub.f32 1.0, %v472_v41 }
  0x8c   : > { %891 = vmatprep.subr.bf16.mxu0 %v1180_v4 }
  0x8d   : > { %914 = vmatpush3.bf16.msra.mxu1 %v913_v59  ;;  %v482_v45 = vrot.slane %v478_v42, %v1405_v39 }
  0x8e   : > { %915 = vmatprep.subr.bf16.mxu1 %v1180_v4 }
  0x8f   : > { %893 = vmatpush3.bf16.msra.mxu0 %v892_v51 }
  0x90   : > { %894 = vmatprep.subr.bf16.mxu0 %v1180_v4 }
  0x91   : > { %917 = vmatpush3.bf16.msra.mxu1 %v916_v0 }
  0x92   : > { %918 = vmatprep.subr.bf16.mxu1 %v1180_v4 }
  0x93   : > { %896 = vmatpush3.bf16.msra.mxu0 %v895_v60 }
  0x94   : > { %921 = vmatprep.subr.bf16.mxu0 %v1180_v4 }
  0x95   : > { %920 = vmatpush3.bf16.msra.mxu1 %v919_v3 }
  0x96   : > { %801 = vmatmul.mubr.f32.vlgmr.msra.gmra.mrb[0].mxu0 %v275_v61 }
  0x97   : > { %870 = vmatprep.mubr.msk.f32.mxu0 %vm1181_vm0, %v1182_v7  ;;  %923 = vmatpush3.bf16.msra.mxu0 %v922_v9  ;;  %v490_v7 = vld [vmem:[#allocation8 + $0x120] sm:$0xff] }
  0x98   : > { %924 = vmatprep.subr.bf16.mxu0 %v1180_v4  ;;  %v928_v13 = vpack.c.bf16 %v491_v12, %v490_v7 }
  0x9b   : > { %926 = vmatpush3.bf16.msra.mxu0 %v925_v11 }
  0x9c   : > { %927 = vmatprep.subr.bf16.mxu0 %v1180_v4 }
  0x9f   : > { %929 = vmatpush3.bf16.msra.mxu0 %v928_v13 }
  0xa0   : > { %930 = vmatprep.subr.bf16.mxu0 %v1180_v4 }
  0xa3   : > { %932 = vmatpush3.bf16.msra.mxu0 %v931_v16 }
  0xa4   : > { %933 = vmatprep.subr.bf16.mxu0 %v1180_v4 }
  0xa7   : > { %935 = vmatpush3.bf16.msra.mxu0 %v934_v19 }
  0xa8   : > { %936 = vmatprep.subr.bf16.mxu0 %v1180_v4 }
  0xab   : > { %938 = vmatpush3.bf16.msra.mxu0 %v937_v22 }
  0xac   : > { %939 = vmatprep.subr.bf16.mxu0 %v1180_v4 }
  0xaf   : > { %941 = vmatpush3.bf16.msra.mxu0 %v940_v36 }
  0xb0   : > { %942 = vmatprep.subr.bf16.mxu0 %v1180_v4  ;;  %v577_v4 = vld [vmem:[#allocation6 + $0x8] sm:$0x1] }
  0xb1   : > { %v583_v52 = vsub.f32 1.0, %v577_v4  ;;  %v581_v54 = vrot.slane %v577_v4, %v1405_v39 }
  0xb3   : > { %944 = vmatpush3.bf16.msra.mxu0 %v943_v40  ;;  %v587_v55 = vrot.slane %v583_v52, %v1405_v39 }
 0x169   : > { %v363_v28 = vpop.f32.mrb[0].mxu0 }
 0x16a   : > { %v364_v29 = vadd.f32 %v710_v26, %v363_v28  ;;  %v802_v30 = vpop.f32.mrb[1].mxu0 }
 0x16c   : > { %v372_v32 = vmul.f32 %v371_v27, %v364_v29 }
 0x16e   : > { %v379_v33 = vadd.f32 %v378_v31, %v372_v32 }
 0x170   : > { %836 = vmatmul.mubr.f32.vlgmr.msra.gmra.mrb[0].mxu1 %v379_v33  ;;  %v483_v50 = vmul.f32 %v482_v45, %v379_v33 }
 0x243   : > { %v468_v46 = vpop.f32.mrb[0].mxu1 }
 0x244   : > { %v469_v47 = vadd.f32 %v711_v43, %v468_v46  ;;  %v837_v48 = vpop.f32.mrb[1].mxu1 }
 0x246   : > { %v477_v49 = vmul.f32 %v476_v44, %v469_v47 }
 0x248   : > { %v484_v51 = vadd.f32 %v483_v50, %v477_v49 }
 0x24a   : > { %871 = vmatmul.mubr.f32.vlgmr.msra.gmra.mrb[2].mxu0 %v484_v51  ;;  %v588_v60 = vmul.f32 %v587_v55, %v484_v51 }
 0x31d   : > { %v573_v56 = vpop.f32.mrb[2].mxu0 }
 0x31e   : > { %v574_v57 = vadd.f32 %v712_v53, %v573_v56  ;;  %v872_v58 = vpop.f32.mrb[3].mxu0 }
 0x320   : > { %v582_v59 = vmul.f32 %v581_v54, %v574_v57 }
 0x322   : > { %v589_v61 = vadd.f32 %v588_v60, %v582_v59 }
 0x324   : > { %590 = vst [vmem:[#allocation2] sm:$0xff] %v589_v61  ;;  %591 = vst [vmem:[%s1385_s23] sm:$0xff] %v589_v61 }
 0x325   : > { %1116 = shalt.err (!%p1113_p10)
}
 0x326   : > { %s1117_s12 = scalar_lea.hbm %s1438_s10, 128  ;;  %s1121_s7 = scalar_lea.hbm %s1486_s4, 1024 }
 0x327   : > { %p1118_p13 = scmp.ne.s32.totalorder %s1438_s10, %s1117_s12  ;;  %p1122_p11 = scmp.lt.u32.totalorder %s1438_s10, %s1486_s4 }
 0x328   : > { %p1123_p8 = scmp.lt.u32.totalorder %s1121_s7, %s1117_s12  ;;  %p1125_p2 = scmp.lt.u32.totalorder %s1117_s12, %s1438_s10 }
 0x329   : > { %p1119_p5 = pnand %p1118_p13, %p1322_p4 }
 0x32a   : > { %p1124_p1 = por %p1123_p8, %p1122_p11 }
 0x32b   : > { %p1120_p0 = pneg %p1119_p5 }
 0x32c   : > { %p1126_p6 = por %p1125_p2, %p1124_p1 }
 0x32e   : > { %p1127_p9 = pnand %p1126_p6, %p1120_p0 }
 0x330   : > { %1130 = shalt.err (!%p1127_p9)
}
 0x331   : > { %955 = dma.vmem_to_hbm [thread:$0]  (%p1322_p4), %s1440_s5, 128, %s1438_s10, %s593_s24  }
 0x332 PF: > { %p977_p12 = scmp.ge.s32.totalorder %s1173_s18, 2  ;;  %s618_s27 = sand.u32 1, %s1161_s15  }
 0x333   : > { %p1502_p3 = scmp.ne.s32.totalorder %s1491_s22, 0  ;;  %s619_s30 = scalar_lea.sflag [#allocation5], %s618_s27 }
 0x335   : > { %p969_p7 = pnand %p977_p12, %p1502_p3 }
 0x337   : > { %1156 = dma.done.wait (!%p969_p7), %s619_s30, 128  }
 0x338   : > { %1158 = vsyncadd (!%p969_p7), %s619_s30, 4294967168  ;;  %p18_p10 = scmp.ge.s32.totalorder %s1312_s9, 10   ;;  %s1503_s15 = smov %s1165_s16 }
 0x339   : > { %s1504_s16 = smov %s1169_s17  ;;  %s1505_s17 = smov %s1328_s14 }
 0x33a   : > { %s1506_s18 = smov %s1312_s9  ;;  %20 = sbr.rel (!%p18_p10) target bundleno = 6 (0x6), region = 95 }
 0x341   :  { %624 = vsyncpa [#allocation4], 1 }
 0x342   :  { %626 = vsyncpa [#allocation4 + $0x1], 1 }
 0x343   :  { %627 = vsyncpa [#allocation7], 1 }
 0x344   :  { %628 = vsyncpa [#allocation5], 1 }
 0x345   :  { %630 = vsyncpa [#allocation5 + $0x1], 1 }

</bundles_post_ra>
